<compile_context>
chip_gen: v5e
topology: v5e:2x2
jax: 0.10.0
libtpu: 0.0.40
codegen_flags: <defaults>
</compile_context>

<pallas_src>
import jax
import jax.numpy as jnp
from jax import lax
from jax.experimental import pallas as pl
from jax.experimental.pallas import tpu as pltpu


# ----------------------------------------------------------------------------
# Kernel 1: gather the context embedding rows straight from HBM and sum (f32).
# ----------------------------------------------------------------------------
def gather_sum_kernel(ids_ref, emb_hbm, sum_ref, ctx_buf, sem):
    # ids_ref : SMEM (B, CTX) int32        (scalar prefetch)
    # emb_hbm : HBM  (V, E)                (memory_space=pl.ANY)
    # sum_ref : VMEM (B, E) f32            (output: context-summed embeddings)
    # ctx_buf : VMEM (B, CTX, E)           (gathered rows)
    # sem     : DMA semaphores (B, CTX)
    B, CTX = ids_ref.shape
    copies = []
    for bb in range(B):                    # all B*CTX row DMAs in flight at once
        for cc in range(CTX):
            cp = pltpu.make_async_copy(
                emb_hbm.at[ids_ref[bb, cc]],     # (E,) row in HBM
                ctx_buf.at[bb, cc],              # (E,) slot in VMEM
                sem.at[bb, cc])
            cp.start()
            copies.append(cp)
    for cp in copies:
        cp.wait()
    # embeddings(inputs).sum(dim=0), per batch row, in f32.
    sum_ref[...] = jnp.sum(ctx_buf[...].astype(jnp.float32), axis=1)


# ----------------------------------------------------------------------------
# Kernel 2: one V tile of logits = summed @ W_t + b, plus softmax partials.
# ----------------------------------------------------------------------------
def logits_kernel(sum_ref, w_ref, b_ref, out_ref, m_ref, l_ref):
    # sum_ref : VMEM (B, E)  f32
    # w_ref   : VMEM (E, TN)               (pre-transposed weight tile)
    # b_ref   : VMEM (1, TN) f32
    # out_ref : VMEM (B, TN) f32           (unnormalized logits tile)
    # m_ref   : VMEM (1, B, 1) f32         (per-tile max)
    # l_ref   : VMEM (1, B, 1) f32         (per-tile sum of exp(logit - max))
    lhs = sum_ref[...]
    if w_ref.dtype != lhs.dtype:           # bf16 weight streaming: bf16 MXU feed,
        lhs = lhs.astype(w_ref.dtype)      # f32 accumulation below.
    logits = lax.dot_general(
        lhs, w_ref[...],
        dimension_numbers=(((1,), (0,)), ((), ())),
        preferred_element_type=jnp.float32) + b_ref[...]
    out_ref[...] = logits
    m = jnp.max(logits, axis=1, keepdims=True)                 # (B, 1)
    l = jnp.sum(jnp.exp(logits - m), axis=1, keepdims=True)    # (B, 1)
    m_ref[...] = m.reshape(m_ref.shape)
    l_ref[...] = l.reshape(l_ref.shape)


# ----------------------------------------------------------------------------
# Host wrapper.
# ----------------------------------------------------------------------------
def cbow_forward(ids, emb_table, w, b, *, tn=2048, weight_dtype=None,
                 vmem_budget_bytes=32 * 1024 * 1024,
                 vmem_limit_bytes=48 * 1024 * 1024):
    """CBOW forward.

    ids          : (context,) or (B, context) int word ids
    emb_table    : (V, E) float  embedding table
    w            : (V, E) float  Linear weight (torch layout)
    b            : (V,)   float  Linear bias
    weight_dtype : optional dtype to stream the Linear weight in (e.g.
                   jnp.bfloat16 halves the dominant HBM stream); the matmul
                   still accumulates in f32.
    returns      : (1, V) log-probs for a 1-D `ids`, else (B, V).
    """
    ids2 = ids.reshape(1, -1) if ids.ndim == 1 else ids
    V, E = emb_table.shape
    # Clamp ids: an out-of-range id would otherwise drive an unchecked HBM DMA.
    ids2 = jnp.clip(ids2.astype(jnp.int32), 0, V - 1)
    B, CTX = ids2.shape

    w_dtype = jnp.dtype(weight_dtype) if weight_dtype is not None else jnp.dtype(w.dtype)
    wsize = w_dtype.itemsize

    # ---- V-tile selection: multiple of 256; single tile when it fits VMEM ----
    Vp_one = int(pl.cdiv(V, 256)) * 256

    def working_set(t):  # kernel-2 VMEM: double-buffered w/b/out tiles + summed
        return 2 * (t * E * wsize + t * 4 + B * t * 4) + 2 * B * E * 4

    if working_set(Vp_one) <= vmem_budget_bytes:
        TN = Vp_one                                      # one grid step total
    else:
        TN = min(max(256, (int(tn) // 256) * 256), Vp_one)
        while TN > 256 and working_set(TN) > vmem_budget_bytes:
            TN -= 256
    Vp = int(pl.cdiv(V, TN)) * TN
    NT = Vp // TN

    # ---- pad / lay out parameters (one-time host cost) ------------------------
    b_f32 = b.astype(jnp.float32)
    if Vp != V:
        w_full = jnp.concatenate([w, jnp.zeros((Vp - V, E), w.dtype)], axis=0)
        # -1e30 keeps padded columns inert in the per-tile softmax partials.
        # (Bias stays f32 even for bf16 weights; -1e30 would become -inf in bf16.)
        b_full = jnp.concatenate([b_f32, jnp.full((Vp - V,), -1e30, jnp.float32)])
    else:
        w_full, b_full = w, b_f32
    # Pre-transpose once so the in-kernel contraction is (B,E) @ (E,TN):
    # no per-tile XLU transpose, and TN stays the lane-dense axis.
    w_t = jnp.transpose(w_full).astype(w_dtype)          # (E, Vp)
    b2 = b_full.reshape(1, Vp)

    # ---- kernel 1: embedding gather + context sum -----------------------------
    summed = pl.pallas_call(
        gather_sum_kernel,
        out_shape=jax.ShapeDtypeStruct((B, E), jnp.float32),
        grid_spec=pltpu.PrefetchScalarGridSpec(
            num_scalar_prefetch=1,
            grid=(1,),
            in_specs=[pl.BlockSpec(memory_space=pl.ANY)],   # embedding table: HBM
            out_specs=pl.BlockSpec((B, E), lambda i, ids: (0, 0)),
            scratch_shapes=[
                pltpu.VMEM((B, CTX, E), emb_table.dtype),
                pltpu.SemaphoreType.DMA((B, CTX)),
            ]),
        compiler_params=pltpu.CompilerParams(
            dimension_semantics=("arbitrary",)),
    )(ids2, emb_table)

    # ---- kernel 2: tiled Linear + per-tile softmax partials --------------------
    logits, m_part, l_part = pl.pallas_call(
        logits_kernel,
        out_shape=(
            jax.ShapeDtypeStruct((B, Vp), jnp.float32),
            jax.ShapeDtypeStruct((NT, B, 1), jnp.float32),
            jax.ShapeDtypeStruct((NT, B, 1), jnp.float32),
        ),
        grid_spec=pltpu.PrefetchScalarGridSpec(
            num_scalar_prefetch=0,
            grid=(NT,),
            in_specs=[
                pl.BlockSpec((B, E), lambda j: (0, 0)),       # context sums
                pl.BlockSpec((E, TN), lambda j: (0, j)),      # weight tile
                pl.BlockSpec((1, TN), lambda j: (0, j)),      # bias tile
            ],
            out_specs=(
                pl.BlockSpec((B, TN), lambda j: (0, j)),      # logits tile
                pl.BlockSpec((1, B, 1), lambda j: (j, 0, 0)),  # per-tile max
                pl.BlockSpec((1, B, 1), lambda j: (j, 0, 0)),  # per-tile sum-exp
            )),
        compiler_params=pltpu.CompilerParams(
            # Every V tile is independent -> both v7x TensorCores usable.
            dimension_semantics=("parallel",),
            vmem_limit_bytes=int(vmem_limit_bytes)),
    )(summed, w_t, b2)

    # ---- epilogue: merge partials into the LSE, subtract (fused XLA pass) ------
    m = m_part[..., 0]                                   # (NT, B)
    l = l_part[..., 0]                                   # (NT, B)
    mx = jnp.max(m, axis=0)                              # (B,)
    lse = mx + jnp.log(jnp.sum(l * jnp.exp(m - mx), axis=0))
    return logits[:, :V] - lse[:, None]


if __name__ == "__main__":
    vocab_size = 1024
    embedding_size = 128
    context_size = 8
    batch = 8

    key = jax.random.PRNGKey(0)
    k_emb, k_w, k_b, k_ids = jax.random.split(key, 4)

    # nn.Embedding default init ~ N(0,1); nn.Linear ~ U(-1/sqrt(E), 1/sqrt(E))
    emb_table = jax.random.normal(k_emb, (vocab_size, embedding_size),
                                  dtype=jnp.float32)
    bound = 1.0 / float(embedding_size) ** 0.5
    w = jax.random.uniform(k_w, (vocab_size, embedding_size),
                           minval=-bound, maxval=bound, dtype=jnp.float32)
    b = jax.random.uniform(k_b, (vocab_size,),
                           minval=-bound, maxval=bound, dtype=jnp.float32)

    def ref_forward(ids_row):
        s = emb_table[ids_row].sum(axis=0).reshape(1, -1)
        return jax.nn.log_softmax(s @ w.T + b, axis=1)

    with jax.default_matmul_precision("highest"):
        # --- single context window: exact PyTorch-module semantics, (1, V) out ---
        ids1 = jax.random.randint(k_ids, (context_size,), 0, vocab_size,
                                  dtype=jnp.int32)
        out1 = jax.block_until_ready(cbow_forward(ids1, emb_table, w, b))
        ref1 = ref_forward(ids1)
        assert out1.shape == (1, vocab_size)
        assert jnp.allclose(out1, ref1, atol=1e-3, rtol=1e-4), "single-window mismatch"

        # --- batched windows: amortizes weight streaming / fills MXU rows ---
        idsB = jax.random.randint(jax.random.PRNGKey(1), (batch, context_size),
                                  0, vocab_size, dtype=jnp.int32)
        outB = jax.block_until_ready(cbow_forward(idsB, emb_table, w, b))
        refB = jnp.concatenate([ref_forward(idsB[i]) for i in range(batch)], axis=0)
        assert outB.shape == (batch, vocab_size)
        assert jnp.allclose(outB, refB, atol=1e-3, rtol=1e-4), "batched mismatch"

        # --- bf16 weight streaming (halves the dominant HBM stream) ---
        outbf = jax.block_until_ready(
            cbow_forward(idsB, emb_table, w, b, weight_dtype=jnp.bfloat16))
        assert jnp.allclose(outbf, refB, atol=5e-2, rtol=1e-2), "bf16 mismatch"

    print("KERNEL_OK")
</pallas_src>

<mosaic_0001>
module attributes {stable_mosaic.version = 11 : i64} {
  func.func @gather_sum_kernel(%arg0: i32, %arg1: memref<1x8xi32, #tpu.memory_space<smem>>, %arg2: memref<1024x128xf32, #tpu.memory_space<any>>, %arg3: memref<1x128xf32, #tpu.memory_space<vmem>>, %arg4: memref<1x8x128xf32, #tpu.memory_space<vmem>>, %arg5: memref<1x8x!tpu.dma_semaphore, #tpu.memory_space<semaphore_mem>>) attributes {dimension_semantics = [#tpu.dimension_semantics<arbitrary>], iteration_bounds = array<i64: 1>, scalar_prefetch = 1 : i64, scratch_operands = 2 : i64, tpu.core_type = #tpu.core_type<tc>, window_params = [{}, {pipeline_mode = #tpu.pipeline_mode<synchronous>, transform_indices = @transform_1, window_bounds = array<i64: 1, 128>}]} {
    %c0 = arith.constant 0 : index
    %c0_0 = arith.constant 0 : index
    %0 = memref.load %arg1[%c0, %c0_0] : memref<1x8xi32, #tpu.memory_space<smem>>
    %c0_i32 = arith.constant 0 : i32
    %c0_i32_1 = arith.constant 0 : i32
    %c0_i32_2 = arith.constant 0 : i32
    %c0_i32_3 = arith.constant 0 : i32
    %c0_i32_4 = arith.constant 0 : i32
    %1 = tpu.memref_slice %arg2[%0, %c0_i32_4] : memref<1024x128xf32, #tpu.memory_space<any>> -> memref<1x128xf32, #tpu.memory_space<any>>
    %2 = tpu.memref_squeeze %1 : memref<1x128xf32, #tpu.memory_space<any>> -> memref<128xf32, #tpu.memory_space<any>>
    %c0_i32_5 = arith.constant 0 : i32
    %3 = tpu.memref_slice %arg4[%c0_i32, %c0_i32_1, %c0_i32_5] : memref<1x8x128xf32, #tpu.memory_space<vmem>> -> memref<1x1x128xf32, #tpu.memory_space<vmem>>
    %4 = tpu.memref_squeeze %3 : memref<1x1x128xf32, #tpu.memory_space<vmem>> -> memref<128xf32, #tpu.memory_space<vmem>>
    %5 = tpu.memref_slice %arg5[%c0_i32_2, %c0_i32_3] : memref<1x8x!tpu.dma_semaphore, #tpu.memory_space<semaphore_mem>> -> memref<1x1x!tpu.dma_semaphore, #tpu.memory_space<semaphore_mem>>
    %6 = tpu.memref_squeeze %5 : memref<1x1x!tpu.dma_semaphore, #tpu.memory_space<semaphore_mem>> -> memref<!tpu.dma_semaphore, #tpu.memory_space<semaphore_mem>>
    tpu.enqueue_dma source(%2 : memref<128xf32, #tpu.memory_space<any>>) target(%4 : memref<128xf32, #tpu.memory_space<vmem>>) target_semaphore(%6 : memref<!tpu.dma_semaphore, #tpu.memory_space<semaphore_mem>>)
    %c0_6 = arith.constant 0 : index
    %c1 = arith.constant 1 : index
    %7 = memref.load %arg1[%c0_6, %c1] : memref<1x8xi32, #tpu.memory_space<smem>>
    %c0_i32_7 = arith.constant 0 : i32
    %c1_i32 = arith.constant 1 : i32
    %c0_i32_8 = arith.constant 0 : i32
    %c1_i32_9 = arith.constant 1 : i32
    %c0_i32_10 = arith.constant 0 : i32
    %8 = tpu.memref_slice %arg2[%7, %c0_i32_10] : memref<1024x128xf32, #tpu.memory_space<any>> -> memref<1x128xf32, #tpu.memory_space<any>>
    %9 = tpu.memref_squeeze %8 : memref<1x128xf32, #tpu.memory_space<any>> -> memref<128xf32, #tpu.memory_space<any>>
    %c0_i32_11 = arith.constant 0 : i32
    %10 = tpu.memref_slice %arg4[%c0_i32_7, %c1_i32, %c0_i32_11] : memref<1x8x128xf32, #tpu.memory_space<vmem>> -> memref<1x1x128xf32, #tpu.memory_space<vmem>>
    %11 = tpu.memref_squeeze %10 : memref<1x1x128xf32, #tpu.memory_space<vmem>> -> memref<128xf32, #tpu.memory_space<vmem>>
    %12 = tpu.memref_slice %arg5[%c0_i32_8, %c1_i32_9] : memref<1x8x!tpu.dma_semaphore, #tpu.memory_space<semaphore_mem>> -> memref<1x1x!tpu.dma_semaphore, #tpu.memory_space<semaphore_mem>>
    %13 = tpu.memref_squeeze %12 : memref<1x1x!tpu.dma_semaphore, #tpu.memory_space<semaphore_mem>> -> memref<!tpu.dma_semaphore, #tpu.memory_space<semaphore_mem>>
    tpu.enqueue_dma source(%9 : memref<128xf32, #tpu.memory_space<any>>) target(%11 : memref<128xf32, #tpu.memory_space<vmem>>) target_semaphore(%13 : memref<!tpu.dma_semaphore, #tpu.memory_space<semaphore_mem>>)
    %c0_12 = arith.constant 0 : index
    %c2 = arith.constant 2 : index
    %14 = memref.load %arg1[%c0_12, %c2] : memref<1x8xi32, #tpu.memory_space<smem>>
    %c0_i32_13 = arith.constant 0 : i32
    %c2_i32 = arith.constant 2 : i32
    %c0_i32_14 = arith.constant 0 : i32
    %c2_i32_15 = arith.constant 2 : i32
    %c0_i32_16 = arith.constant 0 : i32
    %15 = tpu.memref_slice %arg2[%14, %c0_i32_16] : memref<1024x128xf32, #tpu.memory_space<any>> -> memref<1x128xf32, #tpu.memory_space<any>>
    %16 = tpu.memref_squeeze %15 : memref<1x128xf32, #tpu.memory_space<any>> -> memref<128xf32, #tpu.memory_space<any>>
    %c0_i32_17 = arith.constant 0 : i32
    %17 = tpu.memref_slice %arg4[%c0_i32_13, %c2_i32, %c0_i32_17] : memref<1x8x128xf32, #tpu.memory_space<vmem>> -> memref<1x1x128xf32, #tpu.memory_space<vmem>>
    %18 = tpu.memref_squeeze %17 : memref<1x1x128xf32, #tpu.memory_space<vmem>> -> memref<128xf32, #tpu.memory_space<vmem>>
    %19 = tpu.memref_slice %arg5[%c0_i32_14, %c2_i32_15] : memref<1x8x!tpu.dma_semaphore, #tpu.memory_space<semaphore_mem>> -> memref<1x1x!tpu.dma_semaphore, #tpu.memory_space<semaphore_mem>>
    %20 = tpu.memref_squeeze %19 : memref<1x1x!tpu.dma_semaphore, #tpu.memory_space<semaphore_mem>> -> memref<!tpu.dma_semaphore, #tpu.memory_space<semaphore_mem>>
    tpu.enqueue_dma source(%16 : memref<128xf32, #tpu.memory_space<any>>) target(%18 : memref<128xf32, #tpu.memory_space<vmem>>) target_semaphore(%20 : memref<!tpu.dma_semaphore, #tpu.memory_space<semaphore_mem>>)
    %c0_18 = arith.constant 0 : index
    %c3 = arith.constant 3 : index
    %21 = memref.load %arg1[%c0_18, %c3] : memref<1x8xi32, #tpu.memory_space<smem>>
    %c0_i32_19 = arith.constant 0 : i32
    %c3_i32 = arith.constant 3 : i32
    %c0_i32_20 = arith.constant 0 : i32
    %c3_i32_21 = arith.constant 3 : i32
    %c0_i32_22 = arith.constant 0 : i32
    %22 = tpu.memref_slice %arg2[%21, %c0_i32_22] : memref<1024x128xf32, #tpu.memory_space<any>> -> memref<1x128xf32, #tpu.memory_space<any>>
    %23 = tpu.memref_squeeze %22 : memref<1x128xf32, #tpu.memory_space<any>> -> memref<128xf32, #tpu.memory_space<any>>
    %c0_i32_23 = arith.constant 0 : i32
    %24 = tpu.memref_slice %arg4[%c0_i32_19, %c3_i32, %c0_i32_23] : memref<1x8x128xf32, #tpu.memory_space<vmem>> -> memref<1x1x128xf32, #tpu.memory_space<vmem>>
    %25 = tpu.memref_squeeze %24 : memref<1x1x128xf32, #tpu.memory_space<vmem>> -> memref<128xf32, #tpu.memory_space<vmem>>
    %26 = tpu.memref_slice %arg5[%c0_i32_20, %c3_i32_21] : memref<1x8x!tpu.dma_semaphore, #tpu.memory_space<semaphore_mem>> -> memref<1x1x!tpu.dma_semaphore, #tpu.memory_space<semaphore_mem>>
    %27 = tpu.memref_squeeze %26 : memref<1x1x!tpu.dma_semaphore, #tpu.memory_space<semaphore_mem>> -> memref<!tpu.dma_semaphore, #tpu.memory_space<semaphore_mem>>
    tpu.enqueue_dma source(%23 : memref<128xf32, #tpu.memory_space<any>>) target(%25 : memref<128xf32, #tpu.memory_space<vmem>>) target_semaphore(%27 : memref<!tpu.dma_semaphore, #tpu.memory_space<semaphore_mem>>)
    %c0_24 = arith.constant 0 : index
    %c4 = arith.constant 4 : index
    %28 = memref.load %arg1[%c0_24, %c4] : memref<1x8xi32, #tpu.memory_space<smem>>
    %c0_i32_25 = arith.constant 0 : i32
    %c4_i32 = arith.constant 4 : i32
    %c0_i32_26 = arith.constant 0 : i32
    %c4_i32_27 = arith.constant 4 : i32
    %c0_i32_28 = arith.constant 0 : i32
    %29 = tpu.memref_slice %arg2[%28, %c0_i32_28] : memref<1024x128xf32, #tpu.memory_space<any>> -> memref<1x128xf32, #tpu.memory_space<any>>
    %30 = tpu.memref_squeeze %29 : memref<1x128xf32, #tpu.memory_space<any>> -> memref<128xf32, #tpu.memory_space<any>>
    %c0_i32_29 = arith.constant 0 : i32
    %31 = tpu.memref_slice %arg4[%c0_i32_25, %c4_i32, %c0_i32_29] : memref<1x8x128xf32, #tpu.memory_space<vmem>> -> memref<1x1x128xf32, #tpu.memory_space<vmem>>
    %32 = tpu.memref_squeeze %31 : memref<1x1x128xf32, #tpu.memory_space<vmem>> -> memref<128xf32, #tpu.memory_space<vmem>>
    %33 = tpu.memref_slice %arg5[%c0_i32_26, %c4_i32_27] : memref<1x8x!tpu.dma_semaphore, #tpu.memory_space<semaphore_mem>> -> memref<1x1x!tpu.dma_semaphore, #tpu.memory_space<semaphore_mem>>
    %34 = tpu.memref_squeeze %33 : memref<1x1x!tpu.dma_semaphore, #tpu.memory_space<semaphore_mem>> -> memref<!tpu.dma_semaphore, #tpu.memory_space<semaphore_mem>>
    tpu.enqueue_dma source(%30 : memref<128xf32, #tpu.memory_space<any>>) target(%32 : memref<128xf32, #tpu.memory_space<vmem>>) target_semaphore(%34 : memref<!tpu.dma_semaphore, #tpu.memory_space<semaphore_mem>>)
    %c0_30 = arith.constant 0 : index
    %c5 = arith.constant 5 : index
    %35 = memref.load %arg1[%c0_30, %c5] : memref<1x8xi32, #tpu.memory_space<smem>>
    %c0_i32_31 = arith.constant 0 : i32
    %c5_i32 = arith.constant 5 : i32
    %c0_i32_32 = arith.constant 0 : i32
    %c5_i32_33 = arith.constant 5 : i32
    %c0_i32_34 = arith.constant 0 : i32
    %36 = tpu.memref_slice %arg2[%35, %c0_i32_34] : memref<1024x128xf32, #tpu.memory_space<any>> -> memref<1x128xf32, #tpu.memory_space<any>>
    %37 = tpu.memref_squeeze %36 : memref<1x128xf32, #tpu.memory_space<any>> -> memref<128xf32, #tpu.memory_space<any>>
    %c0_i32_35 = arith.constant 0 : i32
    %38 = tpu.memref_slice %arg4[%c0_i32_31, %c5_i32, %c0_i32_35] : memref<1x8x128xf32, #tpu.memory_space<vmem>> -> memref<1x1x128xf32, #tpu.memory_space<vmem>>
    %39 = tpu.memref_squeeze %38 : memref<1x1x128xf32, #tpu.memory_space<vmem>> -> memref<128xf32, #tpu.memory_space<vmem>>
    %40 = tpu.memref_slice %arg5[%c0_i32_32, %c5_i32_33] : memref<1x8x!tpu.dma_semaphore, #tpu.memory_space<semaphore_mem>> -> memref<1x1x!tpu.dma_semaphore, #tpu.memory_space<semaphore_mem>>
    %41 = tpu.memref_squeeze %40 : memref<1x1x!tpu.dma_semaphore, #tpu.memory_space<semaphore_mem>> -> memref<!tpu.dma_semaphore, #tpu.memory_space<semaphore_mem>>
    tpu.enqueue_dma source(%37 : memref<128xf32, #tpu.memory_space<any>>) target(%39 : memref<128xf32, #tpu.memory_space<vmem>>) target_semaphore(%41 : memref<!tpu.dma_semaphore, #tpu.memory_space<semaphore_mem>>)
    %c0_36 = arith.constant 0 : index
    %c6 = arith.constant 6 : index
    %42 = memref.load %arg1[%c0_36, %c6] : memref<1x8xi32, #tpu.memory_space<smem>>
    %c0_i32_37 = arith.constant 0 : i32
    %c6_i32 = arith.constant 6 : i32
    %c0_i32_38 = arith.constant 0 : i32
    %c6_i32_39 = arith.constant 6 : i32
    %c0_i32_40 = arith.constant 0 : i32
    %43 = tpu.memref_slice %arg2[%42, %c0_i32_40] : memref<1024x128xf32, #tpu.memory_space<any>> -> memref<1x128xf32, #tpu.memory_space<any>>
    %44 = tpu.memref_squeeze %43 : memref<1x128xf32, #tpu.memory_space<any>> -> memref<128xf32, #tpu.memory_space<any>>
    %c0_i32_41 = arith.constant 0 : i32
    %45 = tpu.memref_slice %arg4[%c0_i32_37, %c6_i32, %c0_i32_41] : memref<1x8x128xf32, #tpu.memory_space<vmem>> -> memref<1x1x128xf32, #tpu.memory_space<vmem>>
    %46 = tpu.memref_squeeze %45 : memref<1x1x128xf32, #tpu.memory_space<vmem>> -> memref<128xf32, #tpu.memory_space<vmem>>
    %47 = tpu.memref_slice %arg5[%c0_i32_38, %c6_i32_39] : memref<1x8x!tpu.dma_semaphore, #tpu.memory_space<semaphore_mem>> -> memref<1x1x!tpu.dma_semaphore, #tpu.memory_space<semaphore_mem>>
    %48 = tpu.memref_squeeze %47 : memref<1x1x!tpu.dma_semaphore, #tpu.memory_space<semaphore_mem>> -> memref<!tpu.dma_semaphore, #tpu.memory_space<semaphore_mem>>
    tpu.enqueue_dma source(%44 : memref<128xf32, #tpu.memory_space<any>>) target(%46 : memref<128xf32, #tpu.memory_space<vmem>>) target_semaphore(%48 : memref<!tpu.dma_semaphore, #tpu.memory_space<semaphore_mem>>)
    %c0_42 = arith.constant 0 : index
    %c7 = arith.constant 7 : index
    %49 = memref.load %arg1[%c0_42, %c7] : memref<1x8xi32, #tpu.memory_space<smem>>
    %c0_i32_43 = arith.constant 0 : i32
    %c7_i32 = arith.constant 7 : i32
    %c0_i32_44 = arith.constant 0 : i32
    %c7_i32_45 = arith.constant 7 : i32
    %c0_i32_46 = arith.constant 0 : i32
    %50 = tpu.memref_slice %arg2[%49, %c0_i32_46] : memref<1024x128xf32, #tpu.memory_space<any>> -> memref<1x128xf32, #tpu.memory_space<any>>
    %51 = tpu.memref_squeeze %50 : memref<1x128xf32, #tpu.memory_space<any>> -> memref<128xf32, #tpu.memory_space<any>>
    %c0_i32_47 = arith.constant 0 : i32
    %52 = tpu.memref_slice %arg4[%c0_i32_43, %c7_i32, %c0_i32_47] : memref<1x8x128xf32, #tpu.memory_space<vmem>> -> memref<1x1x128xf32, #tpu.memory_space<vmem>>
    %53 = tpu.memref_squeeze %52 : memref<1x1x128xf32, #tpu.memory_space<vmem>> -> memref<128xf32, #tpu.memory_space<vmem>>
    %54 = tpu.memref_slice %arg5[%c0_i32_44, %c7_i32_45] : memref<1x8x!tpu.dma_semaphore, #tpu.memory_space<semaphore_mem>> -> memref<1x1x!tpu.dma_semaphore, #tpu.memory_space<semaphore_mem>>
    %55 = tpu.memref_squeeze %54 : memref<1x1x!tpu.dma_semaphore, #tpu.memory_space<semaphore_mem>> -> memref<!tpu.dma_semaphore, #tpu.memory_space<semaphore_mem>>
    tpu.enqueue_dma source(%51 : memref<128xf32, #tpu.memory_space<any>>) target(%53 : memref<128xf32, #tpu.memory_space<vmem>>) target_semaphore(%55 : memref<!tpu.dma_semaphore, #tpu.memory_space<semaphore_mem>>)
    %c0_i32_48 = arith.constant 0 : i32
    %c0_i32_49 = arith.constant 0 : i32
    %c0_i32_50 = arith.constant 0 : i32
    %c0_i32_51 = arith.constant 0 : i32
    %c0_i32_52 = arith.constant 0 : i32
    %56 = tpu.memref_slice %arg2[%0, %c0_i32_52] : memref<1024x128xf32, #tpu.memory_space<any>> -> memref<1x128xf32, #tpu.memory_space<any>>
    %57 = tpu.memref_squeeze %56 : memref<1x128xf32, #tpu.memory_space<any>> -> memref<128xf32, #tpu.memory_space<any>>
    %c0_i32_53 = arith.constant 0 : i32
    %58 = tpu.memref_slice %arg4[%c0_i32_48, %c0_i32_49, %c0_i32_53] : memref<1x8x128xf32, #tpu.memory_space<vmem>> -> memref<1x1x128xf32, #tpu.memory_space<vmem>>
    %59 = tpu.memref_squeeze %58 : memref<1x1x128xf32, #tpu.memory_space<vmem>> -> memref<128xf32, #tpu.memory_space<vmem>>
    %60 = tpu.memref_slice %arg5[%c0_i32_50, %c0_i32_51] : memref<1x8x!tpu.dma_semaphore, #tpu.memory_space<semaphore_mem>> -> memref<1x1x!tpu.dma_semaphore, #tpu.memory_space<semaphore_mem>>
    %61 = tpu.memref_squeeze %60 : memref<1x1x!tpu.dma_semaphore, #tpu.memory_space<semaphore_mem>> -> memref<!tpu.dma_semaphore, #tpu.memory_space<semaphore_mem>>
    tpu.wait_dma2 semaphore(%61 : memref<!tpu.dma_semaphore, #tpu.memory_space<semaphore_mem>>) src(%57 : memref<128xf32, #tpu.memory_space<any>>) dst(%59 : memref<128xf32, #tpu.memory_space<vmem>>)
    %c0_i32_54 = arith.constant 0 : i32
    %c1_i32_55 = arith.constant 1 : i32
    %c0_i32_56 = arith.constant 0 : i32
    %c1_i32_57 = arith.constant 1 : i32
    %c0_i32_58 = arith.constant 0 : i32
    %62 = tpu.memref_slice %arg2[%7, %c0_i32_58] : memref<1024x128xf32, #tpu.memory_space<any>> -> memref<1x128xf32, #tpu.memory_space<any>>
    %63 = tpu.memref_squeeze %62 : memref<1x128xf32, #tpu.memory_space<any>> -> memref<128xf32, #tpu.memory_space<any>>
    %c0_i32_59 = arith.constant 0 : i32
    %64 = tpu.memref_slice %arg4[%c0_i32_54, %c1_i32_55, %c0_i32_59] : memref<1x8x128xf32, #tpu.memory_space<vmem>> -> memref<1x1x128xf32, #tpu.memory_space<vmem>>
    %65 = tpu.memref_squeeze %64 : memref<1x1x128xf32, #tpu.memory_space<vmem>> -> memref<128xf32, #tpu.memory_space<vmem>>
    %66 = tpu.memref_slice %arg5[%c0_i32_56, %c1_i32_57] : memref<1x8x!tpu.dma_semaphore, #tpu.memory_space<semaphore_mem>> -> memref<1x1x!tpu.dma_semaphore, #tpu.memory_space<semaphore_mem>>
    %67 = tpu.memref_squeeze %66 : memref<1x1x!tpu.dma_semaphore, #tpu.memory_space<semaphore_mem>> -> memref<!tpu.dma_semaphore, #tpu.memory_space<semaphore_mem>>
    tpu.wait_dma2 semaphore(%67 : memref<!tpu.dma_semaphore, #tpu.memory_space<semaphore_mem>>) src(%63 : memref<128xf32, #tpu.memory_space<any>>) dst(%65 : memref<128xf32, #tpu.memory_space<vmem>>)
    %c0_i32_60 = arith.constant 0 : i32
    %c2_i32_61 = arith.constant 2 : i32
    %c0_i32_62 = arith.constant 0 : i32
    %c2_i32_63 = arith.constant 2 : i32
    %c0_i32_64 = arith.constant 0 : i32
    %68 = tpu.memref_slice %arg2[%14, %c0_i32_64] : memref<1024x128xf32, #tpu.memory_space<any>> -> memref<1x128xf32, #tpu.memory_space<any>>
    %69 = tpu.memref_squeeze %68 : memref<1x128xf32, #tpu.memory_space<any>> -> memref<128xf32, #tpu.memory_space<any>>
    %c0_i32_65 = arith.constant 0 : i32
    %70 = tpu.memref_slice %arg4[%c0_i32_60, %c2_i32_61, %c0_i32_65] : memref<1x8x128xf32, #tpu.memory_space<vmem>> -> memref<1x1x128xf32, #tpu.memory_space<vmem>>
    %71 = tpu.memref_squeeze %70 : memref<1x1x128xf32, #tpu.memory_space<vmem>> -> memref<128xf32, #tpu.memory_space<vmem>>
    %72 = tpu.memref_slice %arg5[%c0_i32_62, %c2_i32_63] : memref<1x8x!tpu.dma_semaphore, #tpu.memory_space<semaphore_mem>> -> memref<1x1x!tpu.dma_semaphore, #tpu.memory_space<semaphore_mem>>
    %73 = tpu.memref_squeeze %72 : memref<1x1x!tpu.dma_semaphore, #tpu.memory_space<semaphore_mem>> -> memref<!tpu.dma_semaphore, #tpu.memory_space<semaphore_mem>>
    tpu.wait_dma2 semaphore(%73 : memref<!tpu.dma_semaphore, #tpu.memory_space<semaphore_mem>>) src(%69 : memref<128xf32, #tpu.memory_space<any>>) dst(%71 : memref<128xf32, #tpu.memory_space<vmem>>)
    %c0_i32_66 = arith.constant 0 : i32
    %c3_i32_67 = arith.constant 3 : i32
    %c0_i32_68 = arith.constant 0 : i32
    %c3_i32_69 = arith.constant 3 : i32
    %c0_i32_70 = arith.constant 0 : i32
    %74 = tpu.memref_slice %arg2[%21, %c0_i32_70] : memref<1024x128xf32, #tpu.memory_space<any>> -> memref<1x128xf32, #tpu.memory_space<any>>
    %75 = tpu.memref_squeeze %74 : memref<1x128xf32, #tpu.memory_space<any>> -> memref<128xf32, #tpu.memory_space<any>>
    %c0_i32_71 = arith.constant 0 : i32
    %76 = tpu.memref_slice %arg4[%c0_i32_66, %c3_i32_67, %c0_i32_71] : memref<1x8x128xf32, #tpu.memory_space<vmem>> -> memref<1x1x128xf32, #tpu.memory_space<vmem>>
    %77 = tpu.memref_squeeze %76 : memref<1x1x128xf32, #tpu.memory_space<vmem>> -> memref<128xf32, #tpu.memory_space<vmem>>
    %78 = tpu.memref_slice %arg5[%c0_i32_68, %c3_i32_69] : memref<1x8x!tpu.dma_semaphore, #tpu.memory_space<semaphore_mem>> -> memref<1x1x!tpu.dma_semaphore, #tpu.memory_space<semaphore_mem>>
    %79 = tpu.memref_squeeze %78 : memref<1x1x!tpu.dma_semaphore, #tpu.memory_space<semaphore_mem>> -> memref<!tpu.dma_semaphore, #tpu.memory_space<semaphore_mem>>
    tpu.wait_dma2 semaphore(%79 : memref<!tpu.dma_semaphore, #tpu.memory_space<semaphore_mem>>) src(%75 : memref<128xf32, #tpu.memory_space<any>>) dst(%77 : memref<128xf32, #tpu.memory_space<vmem>>)
    %c0_i32_72 = arith.constant 0 : i32
    %c4_i32_73 = arith.constant 4 : i32
    %c0_i32_74 = arith.constant 0 : i32
    %c4_i32_75 = arith.constant 4 : i32
    %c0_i32_76 = arith.constant 0 : i32
    %80 = tpu.memref_slice %arg2[%28, %c0_i32_76] : memref<1024x128xf32, #tpu.memory_space<any>> -> memref<1x128xf32, #tpu.memory_space<any>>
    %81 = tpu.memref_squeeze %80 : memref<1x128xf32, #tpu.memory_space<any>> -> memref<128xf32, #tpu.memory_space<any>>
    %c0_i32_77 = arith.constant 0 : i32
    %82 = tpu.memref_slice %arg4[%c0_i32_72, %c4_i32_73, %c0_i32_77] : memref<1x8x128xf32, #tpu.memory_space<vmem>> -> memref<1x1x128xf32, #tpu.memory_space<vmem>>
    %83 = tpu.memref_squeeze %82 : memref<1x1x128xf32, #tpu.memory_space<vmem>> -> memref<128xf32, #tpu.memory_space<vmem>>
    %84 = tpu.memref_slice %arg5[%c0_i32_74, %c4_i32_75] : memref<1x8x!tpu.dma_semaphore, #tpu.memory_space<semaphore_mem>> -> memref<1x1x!tpu.dma_semaphore, #tpu.memory_space<semaphore_mem>>
    %85 = tpu.memref_squeeze %84 : memref<1x1x!tpu.dma_semaphore, #tpu.memory_space<semaphore_mem>> -> memref<!tpu.dma_semaphore, #tpu.memory_space<semaphore_mem>>
    tpu.wait_dma2 semaphore(%85 : memref<!tpu.dma_semaphore, #tpu.memory_space<semaphore_mem>>) src(%81 : memref<128xf32, #tpu.memory_space<any>>) dst(%83 : memref<128xf32, #tpu.memory_space<vmem>>)
    %c0_i32_78 = arith.constant 0 : i32
    %c5_i32_79 = arith.constant 5 : i32
    %c0_i32_80 = arith.constant 0 : i32
    %c5_i32_81 = arith.constant 5 : i32
    %c0_i32_82 = arith.constant 0 : i32
    %86 = tpu.memref_slice %arg2[%35, %c0_i32_82] : memref<1024x128xf32, #tpu.memory_space<any>> -> memref<1x128xf32, #tpu.memory_space<any>>
    %87 = tpu.memref_squeeze %86 : memref<1x128xf32, #tpu.memory_space<any>> -> memref<128xf32, #tpu.memory_space<any>>
    %c0_i32_83 = arith.constant 0 : i32
    %88 = tpu.memref_slice %arg4[%c0_i32_78, %c5_i32_79, %c0_i32_83] : memref<1x8x128xf32, #tpu.memory_space<vmem>> -> memref<1x1x128xf32, #tpu.memory_space<vmem>>
    %89 = tpu.memref_squeeze %88 : memref<1x1x128xf32, #tpu.memory_space<vmem>> -> memref<128xf32, #tpu.memory_space<vmem>>
    %90 = tpu.memref_slice %arg5[%c0_i32_80, %c5_i32_81] : memref<1x8x!tpu.dma_semaphore, #tpu.memory_space<semaphore_mem>> -> memref<1x1x!tpu.dma_semaphore, #tpu.memory_space<semaphore_mem>>
    %91 = tpu.memref_squeeze %90 : memref<1x1x!tpu.dma_semaphore, #tpu.memory_space<semaphore_mem>> -> memref<!tpu.dma_semaphore, #tpu.memory_space<semaphore_mem>>
    tpu.wait_dma2 semaphore(%91 : memref<!tpu.dma_semaphore, #tpu.memory_space<semaphore_mem>>) src(%87 : memref<128xf32, #tpu.memory_space<any>>) dst(%89 : memref<128xf32, #tpu.memory_space<vmem>>)
    %c0_i32_84 = arith.constant 0 : i32
    %c6_i32_85 = arith.constant 6 : i32
    %c0_i32_86 = arith.constant 0 : i32
    %c6_i32_87 = arith.constant 6 : i32
    %c0_i32_88 = arith.constant 0 : i32
    %92 = tpu.memref_slice %arg2[%42, %c0_i32_88] : memref<1024x128xf32, #tpu.memory_space<any>> -> memref<1x128xf32, #tpu.memory_space<any>>
    %93 = tpu.memref_squeeze %92 : memref<1x128xf32, #tpu.memory_space<any>> -> memref<128xf32, #tpu.memory_space<any>>
    %c0_i32_89 = arith.constant 0 : i32
    %94 = tpu.memref_slice %arg4[%c0_i32_84, %c6_i32_85, %c0_i32_89] : memref<1x8x128xf32, #tpu.memory_space<vmem>> -> memref<1x1x128xf32, #tpu.memory_space<vmem>>
    %95 = tpu.memref_squeeze %94 : memref<1x1x128xf32, #tpu.memory_space<vmem>> -> memref<128xf32, #tpu.memory_space<vmem>>
    %96 = tpu.memref_slice %arg5[%c0_i32_86, %c6_i32_87] : memref<1x8x!tpu.dma_semaphore, #tpu.memory_space<semaphore_mem>> -> memref<1x1x!tpu.dma_semaphore, #tpu.memory_space<semaphore_mem>>
    %97 = tpu.memref_squeeze %96 : memref<1x1x!tpu.dma_semaphore, #tpu.memory_space<semaphore_mem>> -> memref<!tpu.dma_semaphore, #tpu.memory_space<semaphore_mem>>
    tpu.wait_dma2 semaphore(%97 : memref<!tpu.dma_semaphore, #tpu.memory_space<semaphore_mem>>) src(%93 : memref<128xf32, #tpu.memory_space<any>>) dst(%95 : memref<128xf32, #tpu.memory_space<vmem>>)
    %c0_i32_90 = arith.constant 0 : i32
    %c7_i32_91 = arith.constant 7 : i32
    %c0_i32_92 = arith.constant 0 : i32
    %c7_i32_93 = arith.constant 7 : i32
    %c0_i32_94 = arith.constant 0 : i32
    %98 = tpu.memref_slice %arg2[%49, %c0_i32_94] : memref<1024x128xf32, #tpu.memory_space<any>> -> memref<1x128xf32, #tpu.memory_space<any>>
    %99 = tpu.memref_squeeze %98 : memref<1x128xf32, #tpu.memory_space<any>> -> memref<128xf32, #tpu.memory_space<any>>
    %c0_i32_95 = arith.constant 0 : i32
    %100 = tpu.memref_slice %arg4[%c0_i32_90, %c7_i32_91, %c0_i32_95] : memref<1x8x128xf32, #tpu.memory_space<vmem>> -> memref<1x1x128xf32, #tpu.memory_space<vmem>>
    %101 = tpu.memref_squeeze %100 : memref<1x1x128xf32, #tpu.memory_space<vmem>> -> memref<128xf32, #tpu.memory_space<vmem>>
    %102 = tpu.memref_slice %arg5[%c0_i32_92, %c7_i32_93] : memref<1x8x!tpu.dma_semaphore, #tpu.memory_space<semaphore_mem>> -> memref<1x1x!tpu.dma_semaphore, #tpu.memory_space<semaphore_mem>>
    %103 = tpu.memref_squeeze %102 : memref<1x1x!tpu.dma_semaphore, #tpu.memory_space<semaphore_mem>> -> memref<!tpu.dma_semaphore, #tpu.memory_space<semaphore_mem>>
    tpu.wait_dma2 semaphore(%103 : memref<!tpu.dma_semaphore, #tpu.memory_space<semaphore_mem>>) src(%99 : memref<128xf32, #tpu.memory_space<any>>) dst(%101 : memref<128xf32, #tpu.memory_space<vmem>>)
    %c0_96 = arith.constant 0 : index
    %c0_97 = arith.constant 0 : index
    %c0_98 = arith.constant 0 : index
    %104 = vector.load %arg4[%c0_96, %c0_97, %c0_98] : memref<1x8x128xf32, #tpu.memory_space<vmem>>, vector<1x8x128xf32>
    %cst = arith.constant dense<0.000000e+00> : vector<1x128xf32>
    %105 = vector.multi_reduction <add>, %104, %cst [1] : vector<1x8x128xf32> to vector<1x128xf32>
    %c0_99 = arith.constant 0 : index
    %c0_100 = arith.constant 0 : index
    %106 = vector.load %arg3[%c0_99, %c0_100] : memref<1x128xf32, #tpu.memory_space<vmem>>, vector<1x128xf32>
    tpu.vector_store %arg3[%c0_99, %c0_100], %105 {strides = array<i32>} : memref<1x128xf32, #tpu.memory_space<vmem>>, vector<1x128xf32>,
    return
  }
  func.func @transform_1(%arg0: i32, %arg1: memref<1x8xi32, #tpu.memory_space<smem>>) -> (i32, i32) {
    %c0_i32 = arith.constant 0 : i32
    %c0_i32_0 = arith.constant 0 : i32
    %c0_i32_1 = arith.constant 0 : i32
    return %c0_i32, %c0_i32_0 : i32, i32
  }
}

</mosaic_0001>

<bundles_post_ra>
// kernel: tpu_custom_call.1
= control target key start
LH: loop header
LB: loop body
LE: loop exit
PB: predicated region body
PF: predicated region fallthrough
CT: control target
= control target key end

     0   :  { %s526_s12 = smov [#allocation5]   ;;  %s642_s0 = inlined_call_operand.hbm [shape: s32[1,8], index: 0, kind: input, shape index: {}]   ;;  %s643_s1 = inlined_call_operand.hbm [shape: f32[1024,128], index: 1, kind: input, shape index: {}]   ;;  %s644_s2 = inlined_call_operand.hbm [shape: f32[1,128], index: 2, kind: output, shape index: {}]  }
   0x1   :  { %s8_s11 = sshll.u32 %s642_s0, 4  ;;  %s9_s11 = int_to_ptr.hbm [resolvable:$true] %s8_s11 }
   0x2   :  { %11 = dma.hbm_to_smem %s9_s11, 16, %s526_s12, [#allocation4] }
   0x3   :  { %506 = dma.done.wait [#allocation4], 16 }
   0x4   :  { %507 = vsyncadd [#allocation4], 4294967280 }
   0x5   :  { %14 = sfence }
   0x6   :  { %15 = vsyncpa [#allocation7], 0  ;;  %s16_s13 = sld [smem:[#allocation5]]  ;;  %s527_s14 = smov [#allocation2]  }
   0x7   :  { %s27_s15 = sshll.u32 %s527_s14, 4  ;;  %s253_s16 = sld [smem:[#allocation5 + $0x1]]  ;;  %s28_s15 = int_to_ptr.vmem [resolvable:$true] %s27_s15 }
   0x8   :  { %s528_s17 = smov [#allocation2 + $0x1]   ;;  %s556_s19 = sld [smem:[#allocation5 + $0x2]] }
   0x9   :  { %s554_s18 = sshll.u32 %s528_s17, 4  ;;  %s529_s0 = smov [#allocation2 + $0x2]   ;;  %s45_s18 = int_to_ptr.vmem [resolvable:$true] %s554_s18 }
   0xa   :  { %s559_s20 = sshll.u32 %s529_s0, 4  ;;  %s561_s21 = sld [smem:[#allocation5 + $0x3]]  ;;  %s62_s20 = int_to_ptr.vmem [resolvable:$true] %s559_s20 }
   0xb   :  { %s573_s6 = scalar_lea.hbm %s643_s1, 1024 }
   0xc   :  { %s17_s24 = scalar_lea.hbm %s643_s1, %s16_s13 }
   0xd   :  { %s25_s25 = sshll.u32 %s17_s24, 4  ;;  %s32_s28 = scalar_lea.hbm %s643_s1, %s253_s16  ;;  %s26_s25 = int_to_ptr.hbm [resolvable:$true] %s25_s25 }
   0xe   :  { %s42_s29 = sshll.u32 %s32_s28, 4  ;;  %s290_s30 = sshra.s32 %s26_s25, 4  ;;  %s291_s30 = int_to_ptr.hbm [resolvable:$true] %s290_s30  ;;  %s43_s29 = int_to_ptr.hbm [resolvable:$true] %s42_s29 }
   0xf   :  { %s292_s3 = scalar_lea.hbm %s291_s30, 1  ;;  %p295_p1 = scmp.lt.s32.totalorder %s291_s30, %s643_s1 }
  0x10   :  { %p293_p0 = scmp.ne.s32.totalorder %s291_s30, %s292_s3  ;;  %p296_p2 = scmp.lt.s32.totalorder %s573_s6, %s292_s3 }
  0x12   :  { %p297_p3 = por %p296_p2, %p295_p1 }
  0x14   :  { %p298_p4 = pnand %p297_p3, %p293_p0 }
  0x16   :  { %301 = shalt.err (!%p298_p4)  }
  0x17   :  { %30 = dma.hbm_to_vmem [thread:$0]  %s26_s25, 16, %s28_s15, [#allocation3] }
  0x18   :  { %s49_s11 = scalar_lea.hbm %s643_s1, %s556_s19  ;;  %s314_s12 = sshra.s32 %s43_s29, 4  ;;  %s315_s12 = int_to_ptr.hbm [resolvable:$true] %s314_s12 }
  0x19   :  { %s316_s13 = scalar_lea.hbm %s315_s12, 1  ;;  %p319_p6 = scmp.lt.s32.totalorder %s315_s12, %s643_s1 }
  0x1a   :  { %p317_p5 = scmp.ne.s32.totalorder %s315_s12, %s316_s13  ;;  %p320_p7 = scmp.lt.s32.totalorder %s573_s6, %s316_s13 }
  0x1c   :  { %p321_p8 = por %p320_p7, %p319_p6 }
  0x1e   :  { %p322_p9 = pnand %p321_p8, %p317_p5 }
  0x20   :  { %325 = shalt.err (!%p322_p9)  }
  0x21   :  { %47 = dma.hbm_to_vmem [thread:$0]  %s43_s29, 16, %s45_s18, [#allocation3 + $0x1] }
  0x22   :  { %s59_s15 = sshll.u32 %s49_s11, 4  ;;  %s66_s0 = scalar_lea.hbm %s643_s1, %s561_s21  ;;  %s60_s15 = int_to_ptr.hbm [resolvable:$true] %s59_s15 }
  0x23   :  { %s76_s22 = sshll.u32 %s66_s0, 4  ;;  %s338_s23 = sshra.s32 %s60_s15, 4  ;;  %s339_s23 = int_to_ptr.hbm [resolvable:$true] %s338_s23  ;;  %s77_s22 = int_to_ptr.hbm [resolvable:$true] %s76_s22 }
  0x24   :  { %s340_s24 = scalar_lea.hbm %s339_s23, 1  ;;  %p343_p11 = scmp.lt.s32.totalorder %s339_s23, %s643_s1 }
  0x25   :  { %p341_p10 = scmp.ne.s32.totalorder %s339_s23, %s340_s24  ;;  %p344_p12 = scmp.lt.s32.totalorder %s573_s6, %s340_s24 }
  0x27   :  { %p345_p13 = por %p344_p12, %p343_p11 }
  0x29   :  { %p346_p0 = pnand %p345_p13, %p341_p10 }
  0x2b   :  { %349 = shalt.err (!%p346_p0)  }
  0x2c   :  { %64 = dma.hbm_to_vmem [thread:$0]  %s60_s15, 16, %s62_s20, [#allocation3 + $0x2] }
  0x2d   :  { %s530_s18 = smov [#allocation2 + $0x3]   ;;  %s256_s27 = sld [smem:[#allocation5 + $0x4]] }
  0x2e   :  { %s78_s21 = sshll.u32 %s530_s18, 4  ;;  %s362_s28 = sshra.s32 %s77_s22, 4  ;;  %s79_s21 = int_to_ptr.vmem [resolvable:$true] %s78_s21  ;;  %s363_s28 = int_to_ptr.hbm [resolvable:$true] %s362_s28 }
  0x2f   :  { %s364_s29 = scalar_lea.hbm %s363_s28, 1  ;;  %p367_p2 = scmp.lt.s32.totalorder %s363_s28, %s643_s1 }
  0x30   :  { %p365_p1 = scmp.ne.s32.totalorder %s363_s28, %s364_s29  ;;  %p368_p3 = scmp.lt.s32.totalorder %s573_s6, %s364_s29 }
  0x32   :  { %p369_p4 = por %p368_p3, %p367_p2 }
  0x34   :  { %p370_p5 = pnand %p369_p4, %p365_p1 }
  0x36   :  { %373 = shalt.err (!%p370_p5)  }
  0x37   :  { %81 = dma.hbm_to_vmem [thread:$0]  %s77_s22, 16, %s79_s21, [#allocation3 + $0x3] }
  0x38   :  { %s531_s4 = smov [#allocation2 + $0x4]   ;;  %s257_s5 = sld [smem:[#allocation5 + $0x5]] }
  0x39   :  { %s95_s20 = sshll.u32 %s531_s4, 4  ;;  %s532_s7 = smov [#allocation2 + $0x5]   ;;  %s96_s20 = int_to_ptr.vmem [resolvable:$true] %s95_s20 }
  0x3a   :  { %s603_s8 = sshll.u32 %s532_s7, 4  ;;  %s258_s9 = sld [smem:[#allocation5 + $0x6]]  ;;  %s113_s8 = int_to_ptr.vmem [resolvable:$true] %s603_s8 }
  0x3b   :  { %s83_s12 = scalar_lea.hbm %s643_s1, %s256_s27  ;;  %s533_s14 = smov [#allocation2 + $0x6]  }
  0x3c   :  { %s93_s13 = sshll.u32 %s83_s12, 4  ;;  %s609_s16 = sshll.u32 %s533_s14, 4  ;;  %s94_s13 = int_to_ptr.hbm [resolvable:$true] %s93_s13  ;;  %s130_s16 = int_to_ptr.vmem [resolvable:$true] %s609_s16 }
  0x3d   :  { %s386_s15 = sshra.s32 %s94_s13, 4  ;;  %s387_s15 = int_to_ptr.hbm [resolvable:$true] %s386_s15 }
  0x3e   :  { %s388_s17 = scalar_lea.hbm %s387_s15, 1  ;;  %p391_p7 = scmp.lt.s32.totalorder %s387_s15, %s643_s1 }
  0x3f   :  { %p389_p6 = scmp.ne.s32.totalorder %s387_s15, %s388_s17  ;;  %p392_p8 = scmp.lt.s32.totalorder %s573_s6, %s388_s17 }
  0x41   :  { %p393_p9 = por %p392_p8, %p391_p7 }
  0x43   :  { %p394_p10 = pnand %p393_p9, %p389_p6 }
  0x45   :  { %397 = shalt.err (!%p394_p10)  }
  0x46   :  { %98 = dma.hbm_to_vmem [thread:$0]  %s94_s13, 16, %s96_s20, [#allocation3 + $0x4] }
  0x47   :  { %s100_s24 = scalar_lea.hbm %s643_s1, %s257_s5  ;;  %s117_s21 = scalar_lea.hbm %s643_s1, %s258_s9 }
  0x48   :  { %s110_s25 = sshll.u32 %s100_s24, 4  ;;  %s127_s27 = sshll.u32 %s117_s21, 4  ;;  %s111_s25 = int_to_ptr.hbm [resolvable:$true] %s110_s25  ;;  %s128_s27 = int_to_ptr.hbm [resolvable:$true] %s127_s27 }
  0x49   :  { %s410_s28 = sshra.s32 %s111_s25, 4  ;;  %s411_s28 = int_to_ptr.hbm [resolvable:$true] %s410_s28 }
  0x4a   :  { %s412_s29 = scalar_lea.hbm %s411_s28, 1  ;;  %p415_p12 = scmp.lt.s32.totalorder %s411_s28, %s643_s1 }
  0x4b   :  { %p413_p11 = scmp.ne.s32.totalorder %s411_s28, %s412_s29  ;;  %p416_p13 = scmp.lt.s32.totalorder %s573_s6, %s412_s29 }
  0x4d   :  { %p417_p0 = por %p416_p13, %p415_p12 }
  0x4f   :  { %p418_p1 = pnand %p417_p0, %p413_p11 }
  0x51   :  { %421 = shalt.err (!%p418_p1)  }
  0x52   :  { %115 = dma.hbm_to_vmem [thread:$0]  %s111_s25, 16, %s113_s8, [#allocation3 + $0x5] }
  0x53   :  { %s259_s4 = sld [smem:[#allocation5 + $0x7]]  ;;  %s434_s20 = sshra.s32 %s128_s27, 4  ;;  %s435_s20 = int_to_ptr.hbm [resolvable:$true] %s434_s20 }
  0x54   :  { %s436_s5 = scalar_lea.hbm %s435_s20, 1  ;;  %p439_p3 = scmp.lt.s32.totalorder %s435_s20, %s643_s1 }
  0x55   :  { %p437_p2 = scmp.ne.s32.totalorder %s435_s20, %s436_s5  ;;  %p440_p4 = scmp.lt.s32.totalorder %s573_s6, %s436_s5 }
  0x57   :  { %p441_p5 = por %p440_p4, %p439_p3 }
  0x59   :  { %p442_p6 = pnand %p441_p5, %p437_p2 }
  0x5b   :  { %445 = shalt.err (!%p442_p6)  }
  0x5c   :  { %132 = dma.hbm_to_vmem [thread:$0]  %s128_s27, 16, %s130_s16, [#allocation3 + $0x6] }
  0x5d   :  { %s534_s10 = smov [#allocation2 + $0x7]   ;;  %s134_s13 = scalar_lea.hbm %s643_s1, %s259_s4 }
  0x5e   :  { %s146_s11 = sshll.u32 %s534_s10, 4  ;;  %s144_s14 = sshll.u32 %s134_s13, 4  ;;  %s147_s11 = int_to_ptr.vmem [resolvable:$true] %s146_s11  ;;  %s145_s14 = int_to_ptr.hbm [resolvable:$true] %s144_s14 }
  0x5f   :  { %s458_s15 = sshra.s32 %s145_s14, 4  ;;  %s459_s15 = int_to_ptr.hbm [resolvable:$true] %s458_s15 }
  0x60   :  { %s460_s17 = scalar_lea.hbm %s459_s15, 1  ;;  %p463_p8 = scmp.lt.s32.totalorder %s459_s15, %s643_s1 }
  0x61   :  { %p461_p7 = scmp.ne.s32.totalorder %s459_s15, %s460_s17  ;;  %p464_p9 = scmp.lt.s32.totalorder %s573_s6, %s460_s17 }
  0x63   :  { %p465_p10 = por %p464_p9, %p463_p8 }
  0x65   :  { %p466_p11 = pnand %p465_p10, %p461_p7 }
  0x67   :  { %469 = shalt.err (!%p466_p11)  }
  0x68   :  { %149 = dma.hbm_to_vmem [thread:$0]  %s145_s14, 16, %s147_s11, [#allocation3 + $0x7] }
  0x69   :  { %508 = dma.done.wait [#allocation3], 16 }
  0x6a   :  { %509 = vsyncadd [#allocation3], 4294967280 }
  0x6b   :  { %510 = dma.done.wait [#allocation3 + $0x1], 16 }
  0x6c   :  { %511 = vsyncadd [#allocation3 + $0x1], 4294967280 }
  0x6d   :  { %512 = dma.done.wait [#allocation3 + $0x2], 16 }
  0x6e   :  { %513 = vsyncadd [#allocation3 + $0x2], 4294967280 }
  0x6f   :  { %514 = dma.done.wait [#allocation3 + $0x3], 16 }
  0x70   :  { %515 = vsyncadd [#allocation3 + $0x3], 4294967280 }
  0x71   :  { %516 = dma.done.wait [#allocation3 + $0x4], 16 }
  0x72   :  { %517 = vsyncadd [#allocation3 + $0x4], 4294967280 }
  0x73   :  { %518 = dma.done.wait [#allocation3 + $0x5], 16 }
  0x74   :  { %519 = vsyncadd [#allocation3 + $0x5], 4294967280 }
  0x75   :  { %520 = dma.done.wait [#allocation3 + $0x6], 16 }
  0x76   :  { %521 = vsyncadd [#allocation3 + $0x6], 4294967280 }
  0x77   :  { %522 = dma.done.wait [#allocation3 + $0x7], 16 }
  0x78   :  { %523 = vsyncadd [#allocation3 + $0x7], 4294967280  ;;  %v166_v0 = vld [vmem:[#allocation2] sm:$0xff]  ;;  %s535_s1 = smov [#allocation6]   ;;  %s181_s23 = sshll.u32 %s644_s2, 4  ;;  %s182_s23 = int_to_ptr.hbm [resolvable:$true] %s181_s23 }
  0x79   :  { %v167_v1 = vrot.slane %v166_v0, 4  ;;  %s179_s6 = sshll.u32 %s535_s1, 4  ;;  %s180_s6 = int_to_ptr.vmem [resolvable:$true] %s179_s6 }
  0x7b   :  { %v168_v2 = vadd.f32 %v167_v1, %v166_v0 }
  0x7d   :  { %v169_v3 = vrot.slane %v168_v2, 2 }
  0x7f   :  { %v170_v4 = vadd.f32 %v169_v3, %v168_v2 }
  0x81   :  { %v171_v5 = vrot.slane %v170_v4, 1 }
  0x83   :  { %v172_v6 = vadd.f32 %v171_v5, %v170_v4 }
  0x85   :  { %173 = vst [vmem:[#allocation6] sm:$0x1] %v172_v6 }
  0x86   :  { %184 = dma.vmem_to_hbm [thread:$0]  %s180_s6, 16, %s182_s23, [#allocation7]  }
  0x87   :  { %524 = dma.done.wait [#allocation7], 16  }
  0x88   :  { %525 = vsyncadd [#allocation7], 4294967280 }
  0x89   :  { %189 = vsyncpa [#allocation7], 1 }
  0x8a   :  { %190 = vsyncmov [#allocation3] }
  0x8d   :  { %s191_s24 = vpop.sfrf %190 }
  0x8e   :  { %p260_p12 = scmp.ne.s32.totalorder %s191_s24, 0 }
  0x90   :  { %195 = shalt.err (%p260_p12)  }
  0x91   :  { %197 = vsyncmov [#allocation3 + $0x1] }
  0x94   :  { %s198_s25 = vpop.sfrf %197 }
  0x95   :  { %p261_p13 = scmp.ne.s32.totalorder %s198_s25, 0 }
  0x97   :  { %202 = shalt.err (%p261_p13)  }
  0x98   :  { %204 = vsyncmov [#allocation3 + $0x2] }
  0x9b   :  { %s205_s26 = vpop.sfrf %204 }
  0x9c   :  { %p262_p0 = scmp.ne.s32.totalorder %s205_s26, 0 }
  0x9e   :  { %209 = shalt.err (%p262_p0)  }
  0x9f   :  { %211 = vsyncmov [#allocation3 + $0x3] }
  0xa2   :  { %s212_s2 = vpop.sfrf %211 }
  0xa3   :  { %p263_p1 = scmp.ne.s32.totalorder %s212_s2, 0 }
  0xa5   :  { %216 = shalt.err (%p263_p1)  }
  0xa6   :  { %218 = vsyncmov [#allocation3 + $0x4] }
  0xa9   :  { %s219_s18 = vpop.sfrf %218 }
  0xaa   :  { %p264_p2 = scmp.ne.s32.totalorder %s219_s18, 0 }
  0xac   :  { %223 = shalt.err (%p264_p2)  }
  0xad   :  { %225 = vsyncmov [#allocation3 + $0x5] }
  0xb0   :  { %s226_s21 = vpop.sfrf %225 }
  0xb1   :  { %p265_p3 = scmp.ne.s32.totalorder %s226_s21, 0 }
  0xb3   :  { %230 = shalt.err (%p265_p3)  }
  0xb4   :  { %232 = vsyncmov [#allocation3 + $0x6] }
  0xb7   :  { %s233_s27 = vpop.sfrf %232 }
  0xb8   :  { %p266_p4 = scmp.ne.s32.totalorder %s233_s27, 0 }
  0xba   :  { %237 = shalt.err (%p266_p4)  }
  0xbb   :  { %239 = vsyncmov [#allocation3 + $0x7] }
  0xbe   :  { %s240_s28 = vpop.sfrf %239 }
  0xbf   :  { %p267_p5 = scmp.ne.s32.totalorder %s240_s28, 0 }
  0xc1   :  { %244 = shalt.err (%p267_p5)  }

</bundles_post_ra>
